<compile_context>
chip_gen: v7x
topology: tpu7x:2x2x1
jax: 0.10.0
libtpu: 0.0.40
codegen_flags: <defaults>
</compile_context>

<pallas_src>
import functools

import jax
import jax.numpy as jnp
from jax import lax
from jax.experimental import pallas as pl
from jax.experimental.pallas import tpu as pltpu


def _round_up(x, m):
    return ((x + m - 1) // m) * m


def fc_relu_kernel(x_ref, w_ref, b_ref, o_ref, acc_ref):
    """One (tm, tn) output tile, accumulated over the K grid axis.

    x_ref: (tm, tk)        activation tile
    w_ref: (tn, tk)        weight tile in PyTorch (out, in) layout -> contract dim 1 vs dim 1
    b_ref: (1,  tn)        bias tile
    o_ref: (tm, tn)        output tile
    acc_ref: (tm, tn) f32  VMEM accumulator scratch (lives across the K axis)
    """
    k = pl.program_id(2)

    @pl.when(k == 0)
    def _init():
        acc_ref[...] = jnp.zeros_like(acc_ref)

    # MXU matmul: (tm, tk) x (tn, tk)^T -> (tm, tn), f32 accumulation.
    acc_ref[...] += lax.dot_general(
        x_ref[...], w_ref[...],
        dimension_numbers=(((1,), (1,)), ((), ())),
        preferred_element_type=jnp.float32,
    )

    @pl.when(k == pl.num_programs(2) - 1)
    def _finalize():
        # Bias add + ReLU on the VPU (free filler under the MXU-bound loop).
        o_ref[...] = jnp.maximum(acc_ref[...] + b_ref[...], 0.0).astype(o_ref.dtype)


@functools.partial(jax.jit, static_argnames=("tm", "tn", "tk", "use_bf16"))
def fclayer_forward(x, weight, bias, *, tm=256, tn=256, tk=512, use_bf16=False):
    """x: (B, in_s); weight: (out_s, in_s) (PyTorch Linear layout); bias: (out_s,)."""
    B, in_s = x.shape
    out_s = weight.shape[0]
    out_dtype = x.dtype

    # Clamp tile sizes to (padded) problem dims while keeping (8, 128) alignment.
    tm = min(tm, _round_up(B, 8))
    tn = min(tn, _round_up(out_s, 128))
    tk = min(tk, _round_up(in_s, 128))

    Mp = _round_up(B, tm)
    Np = _round_up(out_s, tn)
    Kp = _round_up(in_s, tk)

    # Zero-pad to tile multiples (padded K contributes 0 to the dot; padded M/N rows/cols
    # are sliced off below). Keeps every store lane-dense (Np is a multiple of 128).
    x_p = jnp.pad(x, ((0, Mp - B), (0, Kp - in_s)))
    w_p = jnp.pad(weight, ((0, Np - out_s), (0, Kp - in_s)))
    b_p = jnp.pad(bias, (0, Np - out_s)).reshape(1, Np)

    if use_bf16:  # v6e/v7x MXU runs bf16 at full rate; accumulation stays f32.
        x_p = x_p.astype(jnp.bfloat16)
        w_p = w_p.astype(jnp.bfloat16)

    grid = (Mp // tm, Np // tn, Kp // tk)

    cost = pl.CostEstimate(
        flops=2 * Mp * Np * Kp,
        transcendentals=0,
        bytes_accessed=(Mp * Kp + Np * Kp + Np + Mp * Np) * 4,
    )

    out_padded = pl.pallas_call(
        fc_relu_kernel,
        out_shape=jax.ShapeDtypeStruct((Mp, Np), out_dtype),
        grid=grid,
        in_specs=[
            pl.BlockSpec((tm, tk), lambda i, j, k: (i, k)),   # x tile
            pl.BlockSpec((tn, tk), lambda i, j, k: (j, k)),   # W tile ((out, in) layout)
            pl.BlockSpec((1, tn), lambda i, j, k: (0, j)),    # bias tile
        ],
        out_specs=pl.BlockSpec((tm, tn), lambda i, j, k: (i, j)),
        scratch_shapes=[pltpu.VMEM((tm, tn), jnp.float32)],
        compiler_params=pltpu.CompilerParams(
            dimension_semantics=("parallel", "parallel", "arbitrary")),
        cost_estimate=cost,
    )(x_p, w_p, b_p)

    return out_padded[:B, :out_s]


def fclayer_ref(x, weight, bias):
    return jnp.maximum(x @ weight.T + bias, 0.0)


if __name__ == "__main__":
    key = jax.random.PRNGKey(0)
    kx, kw, kb = jax.random.split(key, 3)

    # Small shapes consistent with the module (a single Linear layer).
    # NOTE: at this toy size launch overhead dominates; the tiling pays off at real sizes.
    batch, in_s, out_s = 8, 32, 32
    x = jax.random.normal(kx, (batch, in_s), dtype=jnp.float32)
    bound = 1.0 / (in_s ** 0.5)
    weight = jax.random.uniform(kw, (out_s, in_s), dtype=jnp.float32,
                                minval=-bound, maxval=bound)
    bias = jax.random.uniform(kb, (out_s,), dtype=jnp.float32,
                              minval=-bound, maxval=bound)

    out = jax.block_until_ready(fclayer_forward(x, weight, bias))
    ref = fclayer_ref(x, weight, bias)
    assert out.shape == (batch, out_s)
    assert jnp.allclose(out, ref, atol=1e-5, rtol=1e-5)
    print("KERNEL_OK")
</pallas_src>

<mosaic_0001>
module attributes {stable_mosaic.version = 11 : i64} {
  func.func @fc_relu_kernel(%arg0: i32, %arg1: i32, %arg2: i32, %arg3: memref<8x128xf32, #tpu.memory_space<vmem>>, %arg4: memref<128x128xf32, #tpu.memory_space<vmem>>, %arg5: memref<1x128xf32, #tpu.memory_space<vmem>>, %arg6: memref<8x128xf32, #tpu.memory_space<vmem>>, %arg7: memref<8x128xf32, #tpu.memory_space<vmem>>) attributes {dimension_semantics = [#tpu.dimension_semantics<parallel>, #tpu.dimension_semantics<parallel>, #tpu.dimension_semantics<arbitrary>], iteration_bounds = array<i64: 1, 1, 1>, scalar_prefetch = 0 : i64, scratch_operands = 1 : i64, tpu.core_type = #tpu.core_type<tc>, window_params = [{transform_indices = @transform_0, window_bounds = array<i64: 8, 128>}, {transform_indices = @transform_1, window_bounds = array<i64: 128, 128>}, {transform_indices = @transform_2, window_bounds = array<i64: 1, 128>}, {transform_indices = @transform_3, window_bounds = array<i64: 8, 128>}]} {
    %c0_i32 = arith.constant 0 : i32
    %0 = arith.cmpi eq, %arg2, %c0_i32 : i32
    %1 = arith.extui %0 : i1 to i32
    %c0_i32_0 = arith.constant 0 : i32
    %2 = arith.cmpi ne, %1, %c0_i32_0 : i32
    scf.if %2 {
      %cst_10 = arith.constant 0.000000e+00 : f32
      %12 = vector.broadcast %cst_10 : f32 to vector<8x128xf32>
      %c0_11 = arith.constant 0 : index
      %c0_12 = arith.constant 0 : index
      %13 = vector.load %arg7[%c0_11, %c0_12] : memref<8x128xf32, #tpu.memory_space<vmem>>, vector<8x128xf32>
      tpu.vector_store %arg7[%c0_11, %c0_12], %12 {strides = array<i32>} : memref<8x128xf32, #tpu.memory_space<vmem>>, vector<8x128xf32>,
    } else {
    }
    %c0 = arith.constant 0 : index
    %c0_1 = arith.constant 0 : index
    %3 = vector.load %arg7[%c0, %c0_1] : memref<8x128xf32, #tpu.memory_space<vmem>>, vector<8x128xf32>
    %c0_2 = arith.constant 0 : index
    %c0_3 = arith.constant 0 : index
    %4 = vector.load %arg3[%c0_2, %c0_3] : memref<8x128xf32, #tpu.memory_space<vmem>>, vector<8x128xf32>
    %c0_4 = arith.constant 0 : index
    %c0_5 = arith.constant 0 : index
    %5 = vector.load %arg4[%c0_4, %c0_5] : memref<128x128xf32, #tpu.memory_space<vmem>>, vector<128x128xf32>
    %cst = arith.constant dense<0.000000e+00> : vector<8x128xf32>
    %6 = tpu.matmul %4, %5, %cst {dimension_numbers = #tpu.dot_dimension_numbers<[1], [1], [0], [0], [0, 0, 1, 0], [], []>} : vector<8x128xf32>, vector<128x128xf32>, vector<8x128xf32> -> vector<8x128xf32>
    %7 = arith.addf %3, %6 : vector<8x128xf32>
    %c0_6 = arith.constant 0 : index
    %c0_7 = arith.constant 0 : index
    %8 = vector.load %arg7[%c0_6, %c0_7] : memref<8x128xf32, #tpu.memory_space<vmem>>, vector<8x128xf32>
    tpu.vector_store %arg7[%c0_6, %c0_7], %7 {strides = array<i32>} : memref<8x128xf32, #tpu.memory_space<vmem>>, vector<8x128xf32>,
    %c0_i32_8 = arith.constant 0 : i32
    %9 = arith.cmpi eq, %arg2, %c0_i32_8 : i32
    %10 = arith.extui %9 : i1 to i32
    %c0_i32_9 = arith.constant 0 : i32
    %11 = arith.cmpi ne, %10, %c0_i32_9 : i32
    scf.if %11 {
      %c0_10 = arith.constant 0 : index
      %c0_11 = arith.constant 0 : index
      %12 = vector.load %arg7[%c0_10, %c0_11] : memref<8x128xf32, #tpu.memory_space<vmem>>, vector<8x128xf32>
      %c0_12 = arith.constant 0 : index
      %c0_13 = arith.constant 0 : index
      %13 = vector.load %arg5[%c0_12, %c0_13] : memref<1x128xf32, #tpu.memory_space<vmem>>, vector<1x128xf32>
      %14 = vector.broadcast %13 : vector<1x128xf32> to vector<8x128xf32>
      %15 = arith.addf %12, %14 : vector<8x128xf32>
      %cst_14 = arith.constant 0.000000e+00 : f32
      %16 = vector.broadcast %cst_14 : f32 to vector<8x128xf32>
      %17 = arith.maximumf %15, %16 : vector<8x128xf32>
      %c0_15 = arith.constant 0 : index
      %c0_16 = arith.constant 0 : index
      %18 = vector.load %arg6[%c0_15, %c0_16] : memref<8x128xf32, #tpu.memory_space<vmem>>, vector<8x128xf32>
      tpu.vector_store %arg6[%c0_15, %c0_16], %17 {strides = array<i32>} : memref<8x128xf32, #tpu.memory_space<vmem>>, vector<8x128xf32>,
    } else {
    }
    return
  }
  func.func @transform_0(%arg0: i32, %arg1: i32, %arg2: i32) -> (i32, i32) {
    %c0_i32 = arith.constant 0 : i32
    return %arg0, %arg2 : i32, i32
  }
  func.func @transform_1(%arg0: i32, %arg1: i32, %arg2: i32) -> (i32, i32) {
    %c0_i32 = arith.constant 0 : i32
    return %arg1, %arg2 : i32, i32
  }
  func.func @transform_2(%arg0: i32, %arg1: i32, %arg2: i32) -> (i32, i32) {
    %c0_i32 = arith.constant 0 : i32
    %c0_i32_0 = arith.constant 0 : i32
    return %c0_i32, %arg1 : i32, i32
  }
  func.func @transform_3(%arg0: i32, %arg1: i32, %arg2: i32) -> (i32, i32) {
    %c0_i32 = arith.constant 0 : i32
    return %arg0, %arg1 : i32, i32
  }
}

</mosaic_0001>

<bundles_post_ra>
// kernel: fclayer_forward.1
= control target key start
LH: loop header
LB: loop body
LE: loop exit
PB: predicated region body
PF: predicated region fallthrough
CT: control target
= control target key end

     0   :  { %v243_v2 = vmov 0.0|0.0   ;;  %vm244_vm0 = vmmov 0   ;;  %v245_v4 = vmov 0.0   ;;  %s333_s0 = inlined_call_operand.vmem [shape: f32[8,128], index: 0, kind: input, shape index: {}]   ;;  %s334_s1 = inlined_call_operand.vmem [shape: f32[128,128], index: 1, kind: input, shape index: {}]   ;;  %s335_s2 = inlined_call_operand.vmem [shape: f32[1,128], index: 2, kind: input, shape index: {}]   ;;  %s336_s3 = inlined_call_operand.hbm [shape: f32[8,128], index: 3, kind: output, shape index: {}]  }
   0x1   :  { %v22_v0 = vld [vmem:[%s334_s1] sm:$0xff]  ;;  %v23_v1 = vld [vmem:[%s334_s1 + $0x8] sm:$0xff]  ;;  %191 = vmatprep.subr.bf16.mxu0 %v243_v2  ;;  %188 = vmatprep.mubr.msk.f32.mxu0 %vm244_vm0, %v245_v4  ;;  %v24_v5 = vld [vmem:[%s334_s1 + $0x10] sm:$0xff] }
   0x2   :  { %v192_v3 = vpack.c.bf16 %v23_v1, %v22_v0  ;;  %v25_v6 = vld [vmem:[%s334_s1 + $0x18] sm:$0xff] }
   0x4   :  { %193 = vmatpush3.bf16.xpose.msra.mxu0 %v192_v3 }
   0x5   :  { %194 = vmatprep.subr.bf16.mxu0 %v243_v2 }
   0x6   :  { %8 = vsyncpa [#allocation4], 0  ;;  %v195_v7 = vpack.c.bf16 %v25_v6, %v24_v5  ;;  %v26_v8 = vld [vmem:[%s334_s1 + $0x20] sm:$0xff]  ;;  %v27_v9 = vld [vmem:[%s334_s1 + $0x28] sm:$0xff]  ;;  %s246_s21 = smov [#allocation3]  }
   0x7   :  { %v198_v10 = vpack.c.bf16 %v27_v9, %v26_v8  ;;  %v28_v11 = vld [vmem:[%s334_s1 + $0x30] sm:$0xff]  ;;  %v29_v12 = vld [vmem:[%s334_s1 + $0x38] sm:$0xff]  ;;  %v30_v14 = vld [vmem:[%s334_s1 + $0x40] sm:$0xff]  ;;  %s130_s22 = sshll.u32 %s246_s21, 4  ;;  %s131_s22 = int_to_ptr.vmem [resolvable:$true] %s130_s22 }
   0x8   :  { %v201_v13 = vpack.c.bf16 %v29_v12, %v28_v11  ;;  %v31_v15 = vld [vmem:[%s334_s1 + $0x48] sm:$0xff]  ;;  %v32_v17 = vld [vmem:[%s334_s1 + $0x50] sm:$0xff]  ;;  %v33_v18 = vld [vmem:[%s334_s1 + $0x58] sm:$0xff]  ;;  %p224_p1 = scmp.lt.s32.totalorder %s131_s22, %s131_s22 }
   0x9   :  { %v204_v16 = vpack.c.bf16 %v31_v15, %v30_v14  ;;  %v207_v19 = vpack.c.bf16 %v33_v18, %v32_v17  ;;  %v34_v20 = vld [vmem:[%s334_s1 + $0x60] sm:$0xff]  ;;  %v35_v21 = vld [vmem:[%s334_s1 + $0x68] sm:$0xff]  ;;  %v36_v23 = vld [vmem:[%s334_s1 + $0x70] sm:$0xff] }
   0xa   :  { %v210_v22 = vpack.c.bf16 %v35_v21, %v34_v20  ;;  %v37_v24 = vld [vmem:[%s334_s1 + $0x78] sm:$0xff]  ;;  %v21_v26 = vld [vmem:[%s333_s0] sm:$0xff]  ;;  %s219_s1 = scalar_lea.vmem %s131_s22, 128 }
   0xb   :  { %v213_v25 = vpack.c.bf16 %v37_v24, %v36_v23  ;;  %v138_v27 = vld [vmem:[%s335_s2] ss:$0 sm:$0xff]  ;;  %p220_p0 = scmp.ne.s32.totalorder %s131_s22, %s219_s1  ;;  %p225_p2 = scmp.lt.s32.totalorder %s219_s1, %s219_s1 }
   0xc   :  { %196 = vmatpush3.bf16.xpose.msra.mxu0 %v195_v7 }
   0xd   :  { %197 = vmatprep.subr.bf16.mxu0 %v243_v2  ;;  %p226_p3 = por %p225_p2, %p224_p1 }
   0xf   :  { %p227_p4 = pnand %p226_p3, %p220_p0 }
  0x14   :  { %199 = vmatpush3.bf16.xpose.msra.mxu0 %v198_v10 }
  0x15   :  { %200 = vmatprep.subr.bf16.mxu0 %v243_v2 }
  0x1c   :  { %202 = vmatpush3.bf16.xpose.msra.mxu0 %v201_v13 }
  0x1d   :  { %203 = vmatprep.subr.bf16.mxu0 %v243_v2 }
  0x24   :  { %205 = vmatpush3.bf16.xpose.msra.mxu0 %v204_v16 }
  0x25   :  { %206 = vmatprep.subr.bf16.mxu0 %v243_v2 }
  0x2c   :  { %208 = vmatpush3.bf16.xpose.msra.mxu0 %v207_v19 }
  0x2d   :  { %209 = vmatprep.subr.bf16.mxu0 %v243_v2 }
  0x34   :  { %211 = vmatpush3.bf16.xpose.msra.mxu0 %v210_v22 }
  0x35   :  { %212 = vmatprep.subr.bf16.mxu0 %v243_v2 }
  0x3c   :  { %214 = vmatpush3.bf16.xpose.msra.mxu0 %v213_v25 }
  0x43   :  { %189 = vmatmul.mubr.f32.vlgmr.msra.gmra.mrb[0].mxu0 %v21_v26 }
 0x116   :  { %v104_v28 = vpop.f32.mrb[0].mxu0 }
 0x117   :  { %v121_v29 = vadd.f32 %v138_v27, %v104_v28  ;;  %v190_v30 = vpop.f32.mrb[1].mxu0 }
 0x119   :  { %v122_v31 = vmax.f32 %v121_v29, 0.0 }
 0x11b   :  { %123 = vst [vmem:[#allocation3] sm:$0xff] %v122_v31 }
 0x11c   :  { %230 = shalt.err (!%p227_p4)
}
 0x11d   :  { %s231_s24 = scalar_lea.hbm %s336_s3, 128 }
 0x11e   :  { %p232_p5 = scmp.ne.s32.totalorder %s336_s3, %s231_s24  ;;  %p235_p6 = scmp.lt.u32.totalorder %s231_s24, %s336_s3 }
 0x120   :  { %p237_p7 = pnand %p235_p6, %p232_p5 }
 0x122   :  { %240 = shalt.err (!%p237_p7)
}
 0x123   :  { %133 = dma.vmem_to_hbm [thread:$0]  %s131_s22, 128, %s336_s3, [#allocation4]  }
 0x124   :  { %241 = dma.done.wait [#allocation4], 128  }
 0x125   :  { %242 = vsyncadd [#allocation4], 4294967168 }
 0x126   :  { %137 = vsyncpa [#allocation4], 1 }

</bundles_post_ra>
